<compile_context>
chip_gen: v6e
topology: v6e:2x2x1
jax: 0.10.0
libtpu: 0.0.40
codegen_flags: <defaults>
</compile_context>

<pallas_src>
import functools

import jax
import jax.numpy as jnp
from jax.experimental import pallas as pl
from jax.experimental.pallas import tpu as pltpu

STUDENT_TEMP = 0.1
TEACHER_TEMP = 0.07
CENTER_MOMENTUM = 0.9


def _dino_loss_kernel(student_ref, teacher_ref, center_ref, loss_ref, newc_ref,
                      *, true_b, tile_b, steps, acc_rows, needs_mask):
    c_idx = pl.program_id(0)   # partial (core) index
    j = pl.program_id(1)       # batch-tile step within this partial

    @pl.when(j == 0)
    def _init():
        loss_ref[...] = jnp.zeros_like(loss_ref)
        newc_ref[...] = jnp.zeros_like(newc_ref)

    center = center_ref[...].astype(jnp.float32)                       # (1, D)

    if needs_mask:
        row = ((c_idx * steps + j) * tile_b
               + jax.lax.broadcasted_iota(jnp.int32, (tile_b, 1), 0))
        valid = row < true_b                                            # (tile_b, 1)

    # ---- teacher branch first (keeps the live f32 temporary set small) ----
    t = (teacher_ref[...].astype(jnp.float32) - center) * (1.0 / TEACHER_TEMP)
    if needs_mask:
        t = jnp.where(valid, t, 0.0)
    t_max = jnp.max(t, axis=-1, keepdims=True)
    t_exp = jnp.exp(t - t_max)
    t_sum = jnp.sum(t_exp, axis=-1, keepdims=True)
    t_soft = t_exp / t_sum          # exact division: feeds the persistent EMA
    if needs_mask:
        t_soft = jnp.where(valid, t_soft, 0.0)
    # per-row mass of t_soft (~1 for valid rows, exactly 0 for padded rows)
    w_row = jnp.sum(t_soft, axis=-1, keepdims=True)                     # (tile_b, 1)

    # Center partial sums: vreg-aligned VPU adds into the (acc_rows, D) block.
    if acc_rows == 8:
        part = t_soft[0:8, :]
        for g in range(1, tile_b // 8):
            part = part + t_soft[g * 8:(g + 1) * 8, :]
    else:
        part = jnp.sum(t_soft, axis=0, keepdims=True)
    newc_ref[...] += part

    # ---- student branch: cross-entropy via the logsumexp identity ----
    # loss_row = logZ * sum_d(t_soft) - sum_d(t_soft * s_shift); no log_s tensor.
    s = student_ref[...].astype(jnp.float32) * (1.0 / STUDENT_TEMP)
    if needs_mask:
        s = jnp.where(valid, s, 0.0)
    s_max = jnp.max(s, axis=-1, keepdims=True)
    s_shift = s - s_max
    log_z = jnp.log(jnp.sum(jnp.exp(s_shift), axis=-1, keepdims=True))  # (tile_b, 1)
    dot = jnp.sum(t_soft * s_shift, axis=-1, keepdims=True)             # (tile_b, 1)
    tile_loss = jnp.sum(log_z * w_row - dot)                            # scalar
    loss_ref[...] += tile_loss       # broadcast into the (1, 128) lane block


def _vmem_limit_bytes():
    """Generation-aware VMEM limit: ~3/4 of physical (96 MiB v5e/v6e, 48 MiB v7x)."""
    cap = None
    try:
        cap = pltpu.get_tpu_info().vmem_capacity_bytes
    except Exception:
        cap = None
    if not cap:
        cap = 64 * 1024 * 1024      # conservative (v7x-sized) fallback
    return int(cap) * 3 // 4


def _auto_tile_b(batch, d, in_itemsize, vmem_limit):
    """Largest multiple-of-8 batch tile fitting ~2/3 of the VMEM limit.

    Budget: 2 inputs x 2 pipeline buffers (input dtype) + ~3 live (TILE_B, D)
    f32 temporaries inside the body; resident center / accumulator blocks
    subtracted up front.
    """
    budget = (2 * vmem_limit) // 3 - 2 * (1 + 8 + 1) * d * 4
    bytes_per_row = d * (2 * 2 * in_itemsize + 3 * 4)
    cap = int(budget // max(bytes_per_row, 1))
    cap = max(8, (cap // 8) * 8)
    return batch if batch <= cap else cap


def dino_loss(student_output, teacher_output, center, *, tile_b=None, num_partials=2):
    """Returns (loss scalar, updated center [1, D])."""
    B, D = student_output.shape
    assert teacher_output.shape == (B, D)
    assert center.shape == (1, D)
    assert D % 128 == 0, "out_dim must be a multiple of 128 (TPU lane width)"

    vmem_limit = _vmem_limit_bytes()
    if tile_b is None:
        tile_b = _auto_tile_b(B, D, jnp.dtype(student_output.dtype).itemsize,
                              vmem_limit)
    tile_b = min(tile_b, B)
    if tile_b < B:
        tile_b = max(8, (tile_b // 8) * 8)   # partial tiles must be sublane aligned

    num_blocks = pl.cdiv(B, tile_b)
    num_partials = max(1, min(num_partials, num_blocks))
    if num_blocks % num_partials != 0:
        num_partials = 1                     # keep the tile -> grid map exact
    steps = num_blocks // num_partials

    acc_rows = 8 if tile_b % 8 == 0 else 1
    needs_mask = (B % tile_b) != 0

    kernel = functools.partial(
        _dino_loss_kernel, true_b=B, tile_b=tile_b, steps=steps,
        acc_rows=acc_rows, needs_mask=needs_mask)

    loss_parts, center_parts = pl.pallas_call(
        kernel,
        out_shape=(
            jax.ShapeDtypeStruct((1, 128 * num_partials), jnp.float32),
            jax.ShapeDtypeStruct((num_partials * acc_rows, D), jnp.float32),
        ),
        grid_spec=pltpu.PrefetchScalarGridSpec(
            num_scalar_prefetch=0,
            grid=(num_partials, steps),
            in_specs=[
                pl.BlockSpec((tile_b, D), lambda c, j: (c * steps + j, 0)),  # student
                pl.BlockSpec((tile_b, D), lambda c, j: (c * steps + j, 0)),  # teacher
                pl.BlockSpec((1, D), lambda c, j: (0, 0)),                   # center
            ],
            out_specs=(
                pl.BlockSpec((1, 128), lambda c, j: (0, c)),          # per-partial loss
                pl.BlockSpec((acc_rows, D), lambda c, j: (c, 0)),     # per-partial center sum
            ),
        ),
        compiler_params=pltpu.CompilerParams(
            dimension_semantics=("parallel", "arbitrary"),
            vmem_limit_bytes=vmem_limit,
        ),
    )(student_output, teacher_output, center)

    # Tiny epilogue: combine partials, normalize, apply the EMA.
    inv_b = jnp.float32(1.0 / B)
    loss = jnp.sum(loss_parts[0, ::128]) * inv_b
    batch_center = jnp.sum(center_parts, axis=0, keepdims=True) * inv_b
    new_center = (center.astype(jnp.float32) * CENTER_MOMENTUM
                  + batch_center * (1.0 - CENTER_MOMENTUM))
    return loss, new_center


def _reference(student_output, teacher_output, center):
    s = student_output.astype(jnp.float32)
    t = teacher_output.astype(jnp.float32)
    c = center.astype(jnp.float32)
    log_s = jax.nn.log_softmax(s / STUDENT_TEMP, axis=-1)
    t_soft = jax.nn.softmax((t - c) / TEACHER_TEMP, axis=-1)
    loss = jnp.mean(jnp.sum(-t_soft * log_s, axis=-1))
    batch_center = jnp.mean(t_soft, axis=0, keepdims=True)
    new_center = c * CENTER_MOMENTUM + batch_center * (1.0 - CENTER_MOMENTUM)
    return loss, new_center


if __name__ == "__main__":
    key = jax.random.PRNGKey(0)

    def _check(B, D, dtype, tile_b, num_partials=2):
        k = jax.random.fold_in(key, B * 1000 + D)
        k1, k2, k3 = jax.random.split(k, 3)
        student = jax.random.normal(k1, (B, D), dtype=jnp.float32).astype(dtype)
        teacher = jax.random.normal(k2, (B, D), dtype=jnp.float32).astype(dtype)
        center = 0.1 * jax.random.normal(k3, (1, D), dtype=jnp.float32)

        loss, new_center = dino_loss(student, teacher, center,
                                     tile_b=tile_b, num_partials=num_partials)
        jax.block_until_ready((loss, new_center))

        ref_loss, ref_center = _reference(student, teacher, center)
        assert jnp.allclose(loss, ref_loss, rtol=2e-2, atol=1e-3), (
            B, D, dtype, loss, ref_loss)
        assert jnp.allclose(new_center, ref_center, rtol=2e-2, atol=1e-4), (
            B, D, dtype)

    # Two-partial grid with per-partial accumulation over multiple tiles.
    _check(B=32, D=256, dtype=jnp.float32, tile_b=8)
    # Ragged batch (masked tail) split across two partials.
    _check(B=12, D=128, dtype=jnp.float32, tile_b=8)
    # Ragged batch with an odd tile count -> single-partial fallback.
    _check(B=20, D=128, dtype=jnp.float32, tile_b=8)
    # bf16 inputs, auto tile size (single resident block).
    _check(B=16, D=256, dtype=jnp.bfloat16, tile_b=None)
    # Tiny batch below one sublane group (acc_rows == 1 path).
    _check(B=4, D=128, dtype=jnp.float32, tile_b=None)

    print("KERNEL_OK")
</pallas_src>

<mosaic_0001>
module attributes {stable_mosaic.version = 11 : i64} {
  func.func @_dino_loss_kernel(%arg0: i32, %arg1: i32, %arg2: memref<8x256xf32, #tpu.memory_space<vmem>>, %arg3: memref<8x256xf32, #tpu.memory_space<vmem>>, %arg4: memref<1x256xf32, #tpu.memory_space<vmem>>, %arg5: memref<1x128xf32, #tpu.memory_space<vmem>>, %arg6: memref<8x256xf32, #tpu.memory_space<vmem>>) attributes {dimension_semantics = [#tpu.dimension_semantics<parallel>, #tpu.dimension_semantics<arbitrary>], iteration_bounds = array<i64: 2, 2>, scalar_prefetch = 0 : i64, scratch_operands = 0 : i64, tpu.core_type = #tpu.core_type<tc>, window_params = [{transform_indices = @transform_0, window_bounds = array<i64: 8, 256>}, {transform_indices = @transform_1, window_bounds = array<i64: 8, 256>}, {pipeline_mode = #tpu.pipeline_mode<synchronous>, transform_indices = @transform_2, window_bounds = array<i64: 1, 256>}, {transform_indices = @transform_3, window_bounds = array<i64: 1, 128>}, {transform_indices = @transform_4, window_bounds = array<i64: 8, 256>}]} {
    %c0_i32 = arith.constant 0 : i32
    %0 = arith.cmpi eq, %arg1, %c0_i32 : i32
    %1 = arith.extui %0 : i1 to i32
    %c0_i32_0 = arith.constant 0 : i32
    %2 = arith.cmpi ne, %1, %c0_i32_0 : i32
    scf.if %2 {
      %cst_22 = arith.constant 0.000000e+00 : f32
      %47 = vector.broadcast %cst_22 : f32 to vector<1x128xf32>
      %c0_23 = arith.constant 0 : index
      %c0_24 = arith.constant 0 : index
      %48 = vector.load %arg5[%c0_23, %c0_24] : memref<1x128xf32, #tpu.memory_space<vmem>>, vector<1x128xf32>
      tpu.vector_store %arg5[%c0_23, %c0_24], %47 {strides = array<i32>} : memref<1x128xf32, #tpu.memory_space<vmem>>, vector<1x128xf32>,
      %cst_25 = arith.constant 0.000000e+00 : f32
      %49 = vector.broadcast %cst_25 : f32 to vector<8x256xf32>
      %c0_26 = arith.constant 0 : index
      %c0_27 = arith.constant 0 : index
      %50 = vector.load %arg6[%c0_26, %c0_27] : memref<8x256xf32, #tpu.memory_space<vmem>>, vector<8x256xf32>
      tpu.vector_store %arg6[%c0_26, %c0_27], %49 {strides = array<i32>} : memref<8x256xf32, #tpu.memory_space<vmem>>, vector<8x256xf32>,
    } else {
    }
    %c0 = arith.constant 0 : index
    %c0_1 = arith.constant 0 : index
    %3 = vector.load %arg4[%c0, %c0_1] : memref<1x256xf32, #tpu.memory_space<vmem>>, vector<1x256xf32>
    %c0_2 = arith.constant 0 : index
    %c0_3 = arith.constant 0 : index
    %4 = vector.load %arg3[%c0_2, %c0_3] : memref<8x256xf32, #tpu.memory_space<vmem>>, vector<8x256xf32>
    %5 = vector.broadcast %3 : vector<1x256xf32> to vector<8x256xf32>
    %6 = arith.subf %4, %5 : vector<8x256xf32>
    %cst = arith.constant 14.2857141 : f32
    %7 = vector.broadcast %cst : f32 to vector<8x256xf32>
    %8 = arith.mulf %6, %7 : vector<8x256xf32>
    %cst_4 = arith.constant dense<0xFF800000> : vector<8xf32>
    %9 = vector.multi_reduction <maximumf>, %8, %cst_4 [1] : vector<8x256xf32> to vector<8xf32>
    %10 = vector.shape_cast %9 : vector<8xf32> to vector<8x1xf32>
    %11 = vector.broadcast %10 : vector<8x1xf32> to vector<8x256xf32>
    %12 = arith.subf %8, %11 : vector<8x256xf32>
    %13 = math.exp %12 : vector<8x256xf32>
    %cst_5 = arith.constant dense<0.000000e+00> : vector<8xf32>
    %14 = vector.multi_reduction <add>, %13, %cst_5 [1] : vector<8x256xf32> to vector<8xf32>
    %15 = vector.shape_cast %14 : vector<8xf32> to vector<8x1xf32>
    %16 = vector.broadcast %15 : vector<8x1xf32> to vector<8x256xf32>
    %17 = arith.divf %13, %16 : vector<8x256xf32>
    %cst_6 = arith.constant dense<0.000000e+00> : vector<8xf32>
    %18 = vector.multi_reduction <add>, %17, %cst_6 [1] : vector<8x256xf32> to vector<8xf32>
    %19 = vector.shape_cast %18 : vector<8xf32> to vector<8x1xf32>
    %c0_7 = arith.constant 0 : index
    %c0_8 = arith.constant 0 : index
    %20 = vector.load %arg6[%c0_7, %c0_8] : memref<8x256xf32, #tpu.memory_space<vmem>>, vector<8x256xf32>
    %21 = arith.addf %20, %17 : vector<8x256xf32>
    %c0_9 = arith.constant 0 : index
    %c0_10 = arith.constant 0 : index
    %22 = vector.load %arg6[%c0_9, %c0_10] : memref<8x256xf32, #tpu.memory_space<vmem>>, vector<8x256xf32>
    tpu.vector_store %arg6[%c0_9, %c0_10], %21 {strides = array<i32>} : memref<8x256xf32, #tpu.memory_space<vmem>>, vector<8x256xf32>,
    %c0_11 = arith.constant 0 : index
    %c0_12 = arith.constant 0 : index
    %23 = vector.load %arg2[%c0_11, %c0_12] : memref<8x256xf32, #tpu.memory_space<vmem>>, vector<8x256xf32>
    %cst_13 = arith.constant 1.000000e+01 : f32
    %24 = vector.broadcast %cst_13 : f32 to vector<8x256xf32>
    %25 = arith.mulf %23, %24 : vector<8x256xf32>
    %cst_14 = arith.constant dense<0xFF800000> : vector<8xf32>
    %26 = vector.multi_reduction <maximumf>, %25, %cst_14 [1] : vector<8x256xf32> to vector<8xf32>
    %27 = vector.shape_cast %26 : vector<8xf32> to vector<8x1xf32>
    %28 = vector.broadcast %27 : vector<8x1xf32> to vector<8x256xf32>
    %29 = arith.subf %25, %28 : vector<8x256xf32>
    %30 = math.exp %29 : vector<8x256xf32>
    %cst_15 = arith.constant dense<0.000000e+00> : vector<8xf32>
    %31 = vector.multi_reduction <add>, %30, %cst_15 [1] : vector<8x256xf32> to vector<8xf32>
    %32 = vector.shape_cast %31 : vector<8xf32> to vector<8x1xf32>
    %33 = math.log %32 : vector<8x1xf32>
    %34 = arith.mulf %17, %29 : vector<8x256xf32>
    %cst_16 = arith.constant dense<0.000000e+00> : vector<8xf32>
    %35 = vector.multi_reduction <add>, %34, %cst_16 [1] : vector<8x256xf32> to vector<8xf32>
    %36 = vector.shape_cast %35 : vector<8xf32> to vector<8x1xf32>
    %37 = arith.mulf %33, %19 : vector<8x1xf32>
    %38 = arith.subf %37, %36 : vector<8x1xf32>
    %39 = vector.shape_cast %38 : vector<8x1xf32> to vector<1x8x1xf32>
    %cst_17 = arith.constant dense<0.000000e+00> : vector<1xf32>
    %40 = vector.multi_reduction <add>, %39, %cst_17 [1, 2] : vector<1x8x1xf32> to vector<1xf32>
    %41 = vector.shape_cast %40 : vector<1xf32> to vector<1x1x1xf32>
    %42 = vector.extract %41[0, 0, 0] : f32 from vector<1x1x1xf32>
    %c0_18 = arith.constant 0 : index
    %c0_19 = arith.constant 0 : index
    %43 = vector.load %arg5[%c0_18, %c0_19] : memref<1x128xf32, #tpu.memory_space<vmem>>, vector<1x128xf32>
    %44 = vector.broadcast %42 : f32 to vector<1x128xf32>
    %45 = arith.addf %43, %44 : vector<1x128xf32>
    %c0_20 = arith.constant 0 : index
    %c0_21 = arith.constant 0 : index
    %46 = vector.load %arg5[%c0_20, %c0_21] : memref<1x128xf32, #tpu.memory_space<vmem>>, vector<1x128xf32>
    tpu.vector_store %arg5[%c0_20, %c0_21], %45 {strides = array<i32>} : memref<1x128xf32, #tpu.memory_space<vmem>>, vector<1x128xf32>,
    return
  }
  func.func @transform_0(%arg0: i32, %arg1: i32) -> (i32, i32) {
    %c2_i32 = arith.constant 2 : i32
    %0 = arith.muli %arg0, %c2_i32 : i32
    %1 = arith.addi %0, %arg1 : i32
    %c0_i32 = arith.constant 0 : i32
    %c0_i32_0 = arith.constant 0 : i32
    return %1, %c0_i32 : i32, i32
  }
  func.func @transform_1(%arg0: i32, %arg1: i32) -> (i32, i32) {
    %c2_i32 = arith.constant 2 : i32
    %0 = arith.muli %arg0, %c2_i32 : i32
    %1 = arith.addi %0, %arg1 : i32
    %c0_i32 = arith.constant 0 : i32
    %c0_i32_0 = arith.constant 0 : i32
    return %1, %c0_i32 : i32, i32
  }
  func.func @transform_2(%arg0: i32, %arg1: i32) -> (i32, i32) {
    %c0_i32 = arith.constant 0 : i32
    %c0_i32_0 = arith.constant 0 : i32
    %c0_i32_1 = arith.constant 0 : i32
    return %c0_i32, %c0_i32_0 : i32, i32
  }
  func.func @transform_3(%arg0: i32, %arg1: i32) -> (i32, i32) {
    %c0_i32 = arith.constant 0 : i32
    %c0_i32_0 = arith.constant 0 : i32
    return %c0_i32, %arg0 : i32, i32
  }
  func.func @transform_4(%arg0: i32, %arg1: i32) -> (i32, i32) {
    %c0_i32 = arith.constant 0 : i32
    %c0_i32_0 = arith.constant 0 : i32
    return %arg0, %c0_i32 : i32, i32
  }
}

</mosaic_0001>

<bundles_post_ra>
// kernel: tpu_custom_call.1
= control target key start
LH: loop header
LB: loop body
LE: loop exit
PB: predicated region body
PF: predicated region fallthrough
CT: control target
= control target key end

     0   :  { %s1203_s0 = inlined_call_operand.hbm [shape: f32[32,256], index: 0, kind: input, shape index: {}]   ;;  %s1204_s1 = inlined_call_operand.hbm [shape: f32[32,256], index: 1, kind: input, shape index: {}]   ;;  %s1205_s2 = inlined_call_operand.vmem [shape: f32[1,256], index: 2, kind: input, shape index: {}]   ;;  %s1206_s3 = inlined_call_operand.hbm [shape: f32[1,256], index: 3, kind: output, shape index: {0}]   ;;  %s1207_s4 = inlined_call_operand.hbm [shape: f32[16,256], index: 4, kind: output, shape index: {1}]  }
   0x1   :  { %1212 = sst [smem:[#allocation19_spill]] %s1203_s0 }
   0x2   :  { %10 = vsyncpa [#allocation3], 0 }
   0x3   :  { %12 = vsyncpa [#allocation3 + $0x1], 0 }
   0x4   :  { %13 = vsyncpa [#allocation6], 0 }
   0x5   :  { %15 = vsyncpa [#allocation6 + $0x1], 0 }
   0x6   :  { %16 = vsyncpa [#allocation4], 0 }
   0x7   :  { %18 = vsyncpa [#allocation4 + $0x1], 0 }
   0x8   :  { %19 = vsyncpa [#allocation9], 0 }
   0x9   :  { %21 = vsyncpa [#allocation9 + $0x1], 0  ;;  %s946_s15 = smov 0   ;;  %s948_s16 = smov 0  }
   0xa   :  { %s950_s17 = smov 0   ;;  %s952_s18 = smov 0  }
   0xb   :  { %s954_s19 = smov 0   ;;  %s956_s20 = smov 0  }
   0xc   :  { %s958_s21 = smov 0   ;;  %s960_s22 = smov 0  }
   0xd   :  { %s962_s23 = smov 0   ;;  %s964_s24 = smov 0  }
   0xe   :  { %s966_s25 = smov 0  }
   0xf LB: > { %1213 = sst [smem:[#allocation14_spill]] %s906_s23  ;;  %s547_s26 = sadd.s32 4294967295, %s914_s25   ;;  %s914_s25 = sphi %s966_s25, %s27_s25   ;;  %s910_s24 = sphi %s964_s24, %s1229_s24   ;;  %s906_s23 = sphi %s962_s23, %s1228_s23   ;;  %s902_s22 = sphi %s960_s22, %s1227_s22   ;;  %s898_s21 = sphi %s958_s21, %s1226_s21   ;;  %s894_s20 = sphi %s956_s20, %s1235_s20   ;;  %s890_s19 = sphi %s954_s19, %s1234_s19   ;;  %s886_s18 = sphi %s952_s18, %s1233_s18   ;;  %s882_s17 = sphi %s950_s17, %s1232_s17   ;;  %s878_s16 = sphi %s948_s16, %s1231_s16   ;;  %s874_s15 = sphi %s946_s15, %s1230_s15  }
  0x10   : > { %1214 = sst [smem:[#allocation15_spill]] %s910_s24  ;;  %s548_s27 = sadd.s32 4294967294, %s914_s25  }
  0x11   : > { %s36_s28 = sadd.s32 1, %s906_s23  ;;  %s39_s29 = sadd.s32 1, %s910_s24 }
  0x12   : > { %p37_p0 = scmp.ge.s32.totalorder %s36_s28, 2  ;;  %s549_s30 = sshll.u32 %s910_s24, 1 }
  0x13   : > { %s1005_s5 = sadd.s32 %s906_s23, %s549_s30  ;;  %s50_s6 = sadd.s32 1, %s894_s20 }
  0x14   : > { %s1237_s28 = smov (%p37_p0, %s36_s28), 0  ;;  %s1239_s29 = smov (!%p37_p0, %s39_s29), %s910_s24 }
  0x15   : > { %1215 = sst [smem:[#allocation16_spill]] %s1237_s28  ;;  %p57_p1 = scmp.ne.s32.totalorder %s894_s20, %s890_s19 }
  0x16   : > { %p58_p2 = scmp.eq.s32.totalorder %s914_s25, 0  ;;  %p41_p3 = scmp.ge.s32.totalorder %s1239_s29, 2 }
  0x17   : > { %p63_p4 = scmp.ne.s32.totalorder %s890_s19, %s886_s18  ;;  %p64_p6 = scmp.eq.s32.totalorder %s547_s26, 0 }
  0x18   : > { %p1015_p5 = por %p58_p2, %p57_p1  ;;  %s1241_s29 = smov (%p41_p3, %s1239_s29), 0 }
  0x19   : > { %1217 = sst [smem:[#allocation17_spill]] %s1241_s29  ;;  %p1021_p7 = por %p64_p6, %p63_p4 }
  0x1a   : > { %s127_s9 = sadd.s32 1, %s882_s17  ;;  %s550_s10 = sshll.u32 %s1241_s29, 1 }
  0x1b   : > { %s124_s11 = ssub.s32 %s910_s24, %s1241_s29  ;;  %s46_s12 = sadd.s32 %s550_s10, %s1237_s28 }
  0x1c   : > { %p125_p8 = scmp.eq.s32.totalorder %s124_s11, 0  ;;  %s47_s13 = ssub.s32 %s1005_s5, %s46_s12 }
  0x1d   : > { %p137_p9 = scmp.ne.s32.totalorder %s882_s17, %s878_s16  ;;  %p48_p10 = scmp.eq.s32.totalorder %s47_s13, 0 }
  0x1e   : > { %p138_p11 = scmp.eq.s32.totalorder %s547_s26, 3  ;;  %p143_p13 = scmp.ne.s32.totalorder %s878_s16, %s874_s15 }
  0x1f   : > { %s1034_s14 = scalar_select %p125_p8, %s882_s17, %s127_s9  }
  0x20   : > { %s1037_s18 = scalar_select %p48_p10, %s894_s20, %s50_s6  }
  0x21   : > { %p1039_p12 = por %p138_p11, %p137_p9  ;;  %p144_p0 = scmp.eq.s32.totalorder %s548_s27, 3 }
  0x22   : > { %1219 = sst [smem:[#allocation18_spill]] %s1037_s18  ;;  %p601_p1 = scmp.lt.s32.totalorder %s914_s25, 4 }
  0x23   : > { %s1049_s10 = sand.u32 1, %s894_s20   ;;  %p1051_p2 = por %p144_p0, %p143_p13 }
  0x24   : > { %s555_s9 = sshll.u32 %s1049_s10, 4  ;;  %s574_s11 = sshll.u32 %s1005_s5, 8 }
  0x25   : > { %s1222_s0 = sld [smem:[#allocation19_spill]]  ;;  %s197_s29 = scalar_lea.vmem [#allocation2], %s555_s9 }
  0x26   : > { %s207_s28 = sshll.u32 %s197_s29, 4  ;;  %p1062_p3 = pnand %p601_p1, %p1015_p5  ;;  %s208_s28 = int_to_ptr.vmem [resolvable:$true] %s207_s28 }
  0x27   : > { %p563_p4 = scmp.ge.s32.totalorder %s914_s25, 1  ;;  %p233_p6 = scmp.lt.s32.totalorder %s914_s25, 5 }
  0x28   : > { %s194_s24 = scalar_lea.sflag [#allocation3], %s1049_s10  ;;  %p706_p8 = pneg %p1062_p3 }
  0x29   : > { %s717_s5 = scalar_lea.vmem %s208_s28, 256  ;;  %s916_s29 = smov [#allocation2]  }
  0x2a   : > { %p718_p9 = scmp.ne.s32.totalorder %s208_s28, %s717_s5  ;;  %s722_s7 = sshll.u32 %s916_s29, 4  ;;  %s723_s7 = int_to_ptr.vmem [resolvable:$false] %s722_s7 }
  0x2b   : > { %s205_s13 = scalar_lea.hbm %s1222_s0, %s574_s11  ;;  %s724_s6 = scalar_lea.vmem %s723_s7, 512 }
  0x2c   : > { %p720_p10 = pnand %p718_p9, %p706_p8  ;;  %p725_p5 = scmp.lt.s32.totalorder %s208_s28, %s723_s7 }
  0x2d   : > { %p726_p13 = scmp.lt.s32.totalorder %s724_s6, %s717_s5 }
  0x2e   : > { %p721_p11 = pneg %p720_p10 }
  0x2f   : > { %p727_p0 = por %p726_p13, %p725_p5 }
  0x31   : > { %p728_p1 = pnand %p727_p0, %p721_p11 }
  0x33   : > { %731 = shalt.err (!%p728_p1)
}
  0x34   : > { %590 = dma.hbm_to_vmem [thread:$0]  (!%p1062_p3), %s205_s13, 256, %s208_s28, %s194_s24  }
  0x35   : > { %p1080_p9 = pnand %p563_p4, %p233_p6  ;;  %s226_s5 = scalar_lea.hbm %s1204_s1, %s574_s11 }
  0x36   : > { %s218_s7 = scalar_lea.vmem [#allocation5], %s555_s9  ;;  %s215_s23 = scalar_lea.sflag [#allocation6], %s1049_s10 }
  0x37   : > { %s228_s6 = sshll.u32 %s218_s7, 4  ;;  %s917_s24 = smov [#allocation5]   ;;  %s229_s6 = int_to_ptr.vmem [resolvable:$true] %s228_s6 }
  0x38   : > { %s745_s18 = scalar_lea.vmem %s229_s6, 256  ;;  %s750_s28 = sshll.u32 %s917_s24, 4  ;;  %s751_s28 = int_to_ptr.vmem [resolvable:$false] %s750_s28 }
  0x39   : > { %p746_p10 = scmp.ne.s32.totalorder %s229_s6, %s745_s18  ;;  %s752_s13 = scalar_lea.vmem %s751_s28, 512 }
  0x3a   : > { %p753_p4 = scmp.lt.s32.totalorder %s229_s6, %s751_s28  ;;  %p754_p6 = scmp.lt.s32.totalorder %s752_s13, %s745_s18 }
  0x3b   : > { %p748_p11 = pnand %p746_p10, %p706_p8 }
  0x3c   : > { %p755_p13 = por %p754_p6, %p753_p4 }
  0x3d   : > { %p749_p5 = pneg %p748_p11 }
  0x3f   : > { %p756_p0 = pnand %p755_p13, %p749_p5 }
  0x41   : > { %759 = shalt.err (!%p756_p0)
}
  0x42   : > { %593 = dma.hbm_to_vmem [thread:$0]  (!%p1062_p3), %s226_s5, 256, %s229_s6, %s215_s23  }
  0x43   : > { %237 = sbr.rel (%p1080_p9) target bundleno = 773 (0x305), region = 32  ;;  %s239_s0 = sand.u32 (!%p1080_p9), 1, %s890_s19  }
  0x44   : > { %s564_s10 = sshll.u32 (!%p1080_p9), %s239_s0, 4  ;;  %s240_s9 = scalar_lea.sflag (!%p1080_p9), [#allocation3], %s239_s0 }
  0x45   : > { %s1096_s11 = scalar_lea.vmem (!%p1080_p9), [#allocation2], %s564_s10 }
  0x48   : > { %857 = dma.done.wait (%p1021_p7), %s240_s9, 256  }
  0x49   : > { %859 = vsyncadd (%p1021_p7), %s240_s9, 4294967040  ;;  %s249_s18 = scalar_lea.sflag [#allocation6], %s239_s0  ;;  %s252_s29 = scalar_lea.vmem [#allocation5], %s564_s10 }
  0x4a   : > { %861 = dma.done.wait (%p1021_p7), %s249_s18, 256  }
  0x4b   : > { %863 = vsyncadd (%p1021_p7), %s249_s18, 4294967040  ;;  %s1107_s23 = sand.u32 1, %s878_s16   ;;  %p567_p3 = scmp.ne.s32.totalorder %s898_s21, 0 }
  0x4c   : > { %s566_s27 = sshll.u32 %s1107_s23, 4  ;;  %s1111_s12 = scalar_lea.vmem [#allocation7], %s1107_s23 }
  0x4d   : > { %s1113_s5 = scalar_lea.vmem [#allocation8], %s566_s27  ;;  %293 = sbr.rel (%p567_p3) target bundleno = 85 (0x55), region = 44 }
  0x52   : > { %v918_v0 = vmov 0.0  }
  0x53   : > { %294 = vst [vmem:[%s1111_s12] sm:$0x1] %v918_v0  ;;  %295 = vst [vmem:[%s1113_s5] sm:$0xff] %v918_v0 }
  0x54   : > { %296 = vst [vmem:[%s1113_s5 + $0x8] sm:$0xff] %v918_v0 }
  0x55 PF: > { %v301_v1 = vlaneseq  ;;  %v297_v3 = vld [vmem:[%s1205_s2] sm:$0x3]  ;;  %v299_v7 = vld [vmem:[%s252_s29 + $0x8] sm:$0xff]  ;;  %vm364_vm0 = vcmask 7168   ;;  %s576_s21 = sshll.u32 %s902_s22, 8  ;;  %s411_s6 = sshll.u32 %s1113_s5, 4  ;;  %s412_s6 = int_to_ptr.vmem [resolvable:$true] %s411_s6 }
  0x56   : > { %v298_v6 = vld [vmem:[%s252_s29] sm:$0xff]  ;;  %v340_v16 = vld [vmem:[%s1096_s11 + $0x8] sm:$0xff]  ;;  %s409_s13 = scalar_lea.hbm %s1207_s4, %s576_s21  ;;  %s384_s0 = scalar_lea.sflag [#allocation9], %s1107_s23 }
  0x57   : > { %v302_v2 = vshrl.u32 %v301_v1, 7  ;;  %v339_v15 = vld [vmem:[%s1096_s11] sm:$0xff]  ;;  %v342_v18 = vmul.f32 10.0, %v340_v16  ;;  %s760_s10 = scalar_lea.vmem %s412_s6, 256  ;;  %s919_s9 = smov [#allocation8]  }
  0x58   : > { %v341_v17 = vmul.f32 10.0, %v339_v15  ;;  %p761_p7 = scmp.ne.s32.totalorder %s412_s6, %s760_s10  ;;  %s764_s11 = sshll.u32 %s919_s9, 4  ;;  %s765_s11 = int_to_ptr.vmem [resolvable:$false] %s764_s11 }
  0x59   : > { %v303_v4 = vsub.s32 0, %v302_v2  ;;  %v307_v5 = vsub.s32 1, %v302_v2  ;;  %s766_s18 = scalar_lea.vmem %s765_s11, 512  ;;  %p767_p9 = scmp.lt.s32.totalorder %s412_s6, %s765_s11 }
  0x5a   : > { %v343_v19 = vmax.f32 %v341_v17, %v342_v18  ;;  %v333_v38 = vld [vmem:[%s1113_s5] sm:$0xff]  ;;  %p762_p8 = pnand %p761_p7, %p1039_p12  ;;  %p768_p10 = scmp.lt.s32.totalorder %s766_s18, %s760_s10 }
  0x5b   : > { %v304_v8 = vrot.slane %v297_v3, %v303_v4  ;;  %v308_v9 = vrot.slane %v297_v3, %v307_v5  ;;  %v334_v41 = vld [vmem:[%s1113_s5 + $0x8] sm:$0xff] }
  0x5c   : > { %p763_p1 = pneg %p762_p8  ;;  %p769_p11 = por %p768_p10, %p767_p9 }
  0x5d   : > { %v311_v10 = vsub.f32 %v298_v6, %v304_v8  ;;  %v312_v11 = vsub.f32 %v299_v7, %v308_v9 }
  0x5e   : > { %p770_p5 = pnand %p769_p11, %p763_p1 }
  0x5f   : > { %v313_v12 = vmul.f32 14.285714, %v311_v10  ;;  %v314_v13 = vmul.f32 14.285714, %v312_v11 }
  0x61   : > { %v315_v14 = vmax.f32 %v313_v12, %v314_v13 }
  0x63   : > { %316 = vmax.xlane.f32.xlu0 %v315_v14 }
  0x67   : > { %344 = vmax.xlane.f32.xlu0 %v343_v19 }
  0xec   : > { %v317_v20 = vpop.xlane.xlu0 %316 }
  0xed   : > { %v318_v21 = vsub.f32 %v313_v12, %v317_v20  ;;  %v319_v22 = vsub.f32 %v314_v13, %v317_v20 }
  0xef   : > { %v320_v23 = vmul.f32 1.442695, %v318_v21  ;;  %v322_v24 = vmul.f32 1.442695, %v319_v22 }
  0xf0   : > { %v345_v25 = vpop.xlane.xlu0 %344 }
  0xf1   : > { %692 = vpow2.f32 %v320_v23  ;;  %v346_v26 = vsub.f32 %v341_v17, %v345_v25  ;;  %v347_v27 = vsub.f32 %v342_v18, %v345_v25 }
  0xf2   : > { %694 = vpow2.f32 %v322_v24 }
  0xf3   : > { %v348_v28 = vmul.f32 1.442695, %v346_v26  ;;  %v350_v29 = vmul.f32 1.442695, %v347_v27 }
  0xf5   : > { %696 = vpow2.f32 %v348_v28 }
  0xf6   : > { %698 = vpow2.f32 %v350_v29 }
  0xfe   : > { %v693_v30 = vpop.eup %692 }
  0xff   : > { %v695_v31 = vpop.eup %694 }
 0x100   : > { %v324_v32 = vadd.f32 %v695_v31, %v693_v30 }
 0x102   : > { %325 = vadd.xlane.f32.xlu1 %v324_v32  ;;  %v697_v33 = vpop.eup %696 }
 0x103   : > { %v699_v34 = vpop.eup %698 }
 0x104   : > { %v352_v35 = vadd.f32 %v699_v34, %v697_v33 }
 0x106   : > { %353 = vadd.xlane.f32.xlu1 %v352_v35 }
 0x18b   : > { %v326_v36 = vpop.xlane.xlu1 %325 }
 0x18c   : > { %700 = vrcp.f32 %v326_v36 }
 0x18f   : > { %v354_v48 = vpop.xlane.xlu1 %353 }
 0x190   : > { %702 = vlog2.f32 %v354_v48 }
 0x199   : > { %v701_v37 = vpop.eup %700 }
 0x19a   : > { %v328_v39 = vmul.f32 %v701_v37, %v693_v30  ;;  %v329_v40 = vmul.f32 %v701_v37, %v695_v31 }
 0x19c   : > { %v330_v42 = vadd.f32 %v329_v40, %v328_v39  ;;  %v357_v43 = vmul.f32 %v346_v26, %v328_v39  ;;  %v358_v44 = vmul.f32 %v347_v27, %v329_v40  ;;  %v335_v45 = vadd.f32 %v333_v38, %v328_v39 }
 0x19d   : > { %v336_v46 = vadd.f32 %v334_v41, %v329_v40  ;;  %v703_v49 = vpop.eup %702 }
 0x19e   : > { %331 = vadd.xlane.f32.xlu0 %v330_v42  ;;  %v359_v47 = vadd.f32 %v358_v44, %v357_v43  ;;  %337 = vst [vmem:[%s1113_s5] sm:$0xff] %v335_v45  ;;  %v356_v50 = vmul.f32 0.6931472, %v703_v49 }
 0x19f   : > { %338 = vst [vmem:[%s1113_s5 + $0x8] sm:$0xff] %v336_v46 }
 0x1a0   : > { %360 = vadd.xlane.f32.xlu1 %v359_v47 }
 0x227   : > { %v332_v51 = vpop.xlane.xlu0 %331 }
 0x228   : > { %v362_v52 = vmul.f32 %v356_v50, %v332_v51 }
 0x229   : > { %v361_v53 = vpop.xlane.xlu1 %360 }
 0x22a   : > { %v363_v54 = vsub.f32 %v362_v52, %v361_v53 }
 0x22c   : > { %v365_v55 = vsel %vm364_vm0, %v363_v54, 0.0 }
 0x22d   : > { %366 = vadd.xlane.f32.xlu0 %v365_v55 }
 0x22e   : > { %773 = shalt.err (!%p770_p5)
}
 0x22f   : > { %s774_s29 = scalar_lea.hbm %s409_s13, 256  ;;  %s778_s8 = scalar_lea.hbm %s1207_s4, 512 }
 0x230   : > { %p775_p4 = scmp.ne.s32.totalorder %s409_s13, %s774_s29  ;;  %p779_p0 = scmp.lt.s32.totalorder %s409_s13, %s1207_s4 }
 0x231   : > { %p780_p3 = scmp.lt.s32.totalorder %s778_s8, %s774_s29 }
 0x232   : > { %p776_p6 = pnand %p775_p4, %p1039_p12 }
 0x233   : > { %p781_p7 = por %p780_p3, %p779_p0 }
 0x234   : > { %p777_p13 = pneg %p776_p6 }
 0x236   : > { %p782_p8 = pnand %p781_p7, %p777_p13 }
 0x238   : > { %785 = shalt.err (!%p782_p8)
}
 0x239   : > { %584 = dma.vmem_to_hbm [thread:$0]  (%p1039_p12), %s412_s6, 256, %s409_s13, %s384_s0   ;;  %v375_v63 = vld [vmem:[%s1111_s12] sm:$0x1] }
 0x23a   : > { %s569_s24 = sshll.u32 %s902_s22, 4  ;;  %s397_s28 = sshll.u32 %s1111_s12, 4  ;;  %s398_s28 = int_to_ptr.vmem [resolvable:$true] %s397_s28 }
 0x23b   : > { %s395_s6 = scalar_lea.hbm %s1206_s3, %s569_s24  ;;  %s380_s13 = scalar_lea.sflag [#allocation4], %s1107_s23 }
 0x23c   : > { %s786_s0 = scalar_lea.vmem %s398_s28, 16  ;;  %s920_s18 = smov [#allocation7]  }
 0x23d   : > { %p787_p1 = scmp.ne.s32.totalorder %s398_s28, %s786_s0  ;;  %s790_s29 = sshll.u32 %s920_s18, 4  ;;  %s791_s29 = int_to_ptr.vmem [resolvable:$false] %s790_s29 }
 0x23e   : > { %s792_s22 = scalar_lea.vmem %s791_s29, 32  ;;  %p793_p11 = scmp.lt.s32.totalorder %s398_s28, %s791_s29 }
 0x23f   : > { %p788_p9 = pnand %p787_p1, %p1039_p12  ;;  %p794_p5 = scmp.lt.s32.totalorder %s792_s22, %s786_s0 }
 0x241   : > { %p789_p10 = pneg %p788_p9  ;;  %p795_p4 = por %p794_p5, %p793_p11 }
 0x243   : > { %p796_p6 = pnand %p795_p4, %p789_p10 }
 0x2b6   : > { %v367_v56 = vpop.xlane.xlu0 %366 }
 0x2b7   : > { %v368_v57 = vrot.slane %v367_v56, 4 }
 0x2b9   : > { %v369_v58 = vadd.f32 %v368_v57, %v367_v56 }
 0x2bb   : > { %v370_v59 = vrot.slane %v369_v58, 2 }
 0x2bd   : > { %v371_v60 = vadd.f32 %v370_v59, %v369_v58 }
 0x2bf   : > { %v372_v61 = vrot.slane %v371_v60, 1 }
 0x2c1   : > { %v373_v62 = vadd.f32 %v372_v61, %v371_v60 }
 0x2c3   : > { %577 = vpush %v373_v62 }
 0x2f4   : > { %s578_s10 = spop %577 }
 0x2f5   : > { %v376_v0 = vstv %s578_s10 }
 0x2f6   : > { %v377_v1 = vadd.f32 %v376_v0, %v375_v63 }
 0x2f8   : > { %378 = vst [vmem:[%s1111_s12] sm:$0x1] %v377_v1 }
 0x2f9   : > { %799 = shalt.err (!%p796_p6)
}
 0x2fa   : > { %s800_s27 = scalar_lea.hbm %s395_s6, 16  ;;  %s804_s5 = scalar_lea.hbm %s1206_s3, 32 }
 0x2fb   : > { %p801_p13 = scmp.ne.s32.totalorder %s395_s6, %s800_s27  ;;  %p805_p7 = scmp.lt.s32.totalorder %s395_s6, %s1206_s3 }
 0x2fc   : > { %p806_p8 = scmp.lt.s32.totalorder %s804_s5, %s800_s27 }
 0x2fd   : > { %p802_p0 = pnand %p801_p13, %p1039_p12 }
 0x2fe   : > { %p807_p1 = por %p806_p8, %p805_p7 }
 0x2ff   : > { %p803_p3 = pneg %p802_p0 }
 0x301   : > { %p808_p9 = pnand %p807_p1, %p803_p3 }
 0x303   : > { %811 = shalt.err (!%p808_p9)
}
 0x304   : > { %583 = dma.vmem_to_hbm [thread:$0]  (%p1039_p12), %s398_s28, 16, %s395_s6, %s380_s13  }
 0x305 PF: > { %p602_p10 = scmp.ge.s32.totalorder %s914_s25, 2  ;;  %s423_s21 = sand.u32 1, %s874_s15  }
 0x306   : > { %s424_s24 = scalar_lea.sflag [#allocation4], %s423_s21 }
 0x307   : > { %p595_p11 = pnand %p602_p10, %p1051_p2 }
 0x309   : > { %p596_p5 = pneg %p595_p11 }
 0x30b   : > { %865 = dma.done.wait (%p596_p5), %s424_s24, 16  }
 0x30c   : > { %867 = vsyncadd (%p596_p5), %s424_s24, 4294967280  ;;  %s432_s10 = scalar_lea.sflag [#allocation9], %s423_s21 }
 0x30d   : > { %869 = dma.done.wait (%p596_p5), %s432_s10, 256  }
 0x30e   : > { %871 = vsyncadd (%p596_p5), %s432_s10, 4294967040  ;;  %s27_s25 = sadd.s32 1, %s914_s25   ;;  %s1225_s30 = sld [smem:[#allocation18_spill]] }
 0x30f   : > { %p24_p4 = scmp.ge.s32.totalorder %s27_s25, 6   ;;  %s1226_s21 = sld [smem:[#allocation14_spill]] }
 0x310   : > { %s1227_s22 = sld [smem:[#allocation15_spill]]  ;;  %s1230_s15 = smov %s878_s16 }
 0x311   : > { %s1228_s23 = sld [smem:[#allocation16_spill]]  ;;  %s1231_s16 = smov %s882_s17 }
 0x312   : > { %s1229_s24 = sld [smem:[#allocation17_spill]]  ;;  %s1232_s17 = smov %s1034_s14 }
 0x313   : > { %s1233_s18 = smov %s890_s19  ;;  %s1234_s19 = smov %s894_s20 }
 0x314   : > { %s1235_s20 = smov %s1225_s30  ;;  %26 = sbr.rel (!%p24_p4) target bundleno = 15 (0xf), region = 111 }
 0x319   :  { %437 = vsyncpa [#allocation3], 1 }
 0x31a   :  { %439 = vsyncpa [#allocation3 + $0x1], 1 }
 0x31b   :  { %440 = vsyncpa [#allocation6], 1 }
 0x31c   :  { %442 = vsyncpa [#allocation6 + $0x1], 1 }
 0x31d   :  { %443 = vsyncpa [#allocation4], 1 }
 0x31e   :  { %445 = vsyncpa [#allocation4 + $0x1], 1 }
 0x31f   :  { %446 = vsyncpa [#allocation9], 1 }
 0x320   :  { %448 = vsyncpa [#allocation9 + $0x1], 1 }

</bundles_post_ra>
